<compile_context>
chip_gen: v7x
topology: tpu7x:2x2x1
jax: 0.10.0
libtpu: 0.0.40
codegen_flags: <defaults>
</compile_context>

<pallas_src>
import functools

import jax
import jax.numpy as jnp
import numpy as np
from jax.experimental import pallas as pl
from jax.experimental.pallas import tpu as pltpu


def _focal_loss_kernel(t_ref, x_ref, o_ref, *, gamma, alpha):
    x = x_ref[...].astype(jnp.float32)   # (C, tile_n): classes on sublanes, anchors on lanes
    t = t_ref[...]                       # (1, tile_n) int32

    num_classes, tn = x.shape

    # Class index d along the sublane axis; label matching uses d + 1.
    d = jax.lax.broadcasted_iota(jnp.int32, (num_classes, tn), 0)
    c1 = (t == d + 1).astype(jnp.float32)                          # positive class
    c2 = jnp.logical_and(t >= 0, t != d + 1).astype(jnp.float32)   # negatives (incl. bg)

    # Shared stable pieces: a single exp and a single log1p feed sigmoid and both
    # softplus terms.
    abs_x = jnp.abs(x)
    e = jnp.exp(-abs_x)                        # exp(-|x|) in (0, 1]
    log1pe = jnp.log1p(e)                      # softplus(-|x|)
    sp_pos = log1pe + jnp.maximum(x, 0.0)      # softplus(x)  == -log(1 - p)
    sp_neg = log1pe + jnp.maximum(-x, 0.0)     # softplus(-x) == -log(p)
    p = jnp.where(x >= 0.0, 1.0, e) / (1.0 + e)  # sigmoid(x), stable for both signs

    # gamma == 2 specialization: squaring on the VALU instead of pow (exp+log on EUP).
    if float(gamma) == 2.0:
        one_m_p = 1.0 - p
        pow_1mp = one_m_p * one_m_p
        pow_p = p * p
    else:
        pow_1mp = jnp.power(1.0 - p, jnp.float32(gamma))
        pow_p = jnp.power(p, jnp.float32(gamma))

    # log(max(p, FLT_MIN)) == max(log(p), log(FLT_MIN)) since log is monotone.
    log_flt_min = jnp.float32(np.log(np.finfo(np.float32).tiny))
    term1 = pow_1mp * jnp.maximum(-sp_neg, log_flt_min)
    term2 = pow_p * (-sp_pos)

    loss = -c1 * term1 * jnp.float32(alpha) - c2 * term2 * jnp.float32(1.0 - alpha)

    # Per-tile partial sums over the class (sublane) axis; lane-dense (1, tile_n) output.
    o_ref[...] = jnp.sum(loss, axis=0, keepdims=True)


def _round_up(a, b):
    return ((a + b - 1) // b) * b


def sigmoid_focal_loss_sum(logits, targets, gamma=2.0, alpha=0.25, tile_n=2048):
    """Pallas TPU implementation of SigmoidFocalLoss(gamma, alpha)(logits, targets)."""
    N, C = logits.shape

    # Anchor tile: multiple of 128 lanes, no larger than the (padded) anchor count.
    tile_n = _round_up(min(max(tile_n, 128), _round_up(N, 128)), 128)
    n_padded = _round_up(N, tile_n)
    num_tiles = n_padded // tile_n

    # Lane-dense layout: anchors on lanes, classes on sublanes.
    x_t = jnp.transpose(logits)                        # (C, N)
    t_row = targets.astype(jnp.int32).reshape(1, N)    # (1, N)
    if n_padded != N:
        pad = n_padded - N
        x_t = jnp.pad(x_t, ((0, 0), (0, pad)))
        # Padded anchors get label -1 -> both masks are 0 -> exactly zero loss.
        t_row = jnp.pad(t_row, ((0, 0), (0, pad)), constant_values=-1)

    kernel = functools.partial(_focal_loss_kernel, gamma=gamma, alpha=alpha)

    partials = pl.pallas_call(
        kernel,
        out_shape=jax.ShapeDtypeStruct((1, n_padded), jnp.float32),
        grid_spec=pltpu.PrefetchScalarGridSpec(
            num_scalar_prefetch=0,
            grid=(num_tiles,),
            in_specs=[
                pl.BlockSpec((1, tile_n), lambda i: (0, i)),   # targets (lane-dense)
                pl.BlockSpec((C, tile_n), lambda i: (0, i)),   # logits  (C, tile_n)
            ],
            out_specs=pl.BlockSpec((1, tile_n), lambda i: (0, i)),
        ),
        compiler_params=pltpu.CompilerParams(
            dimension_semantics=("parallel",),       # independent tiles -> megacore OK
            vmem_limit_bytes=32 * 1024 * 1024,       # safe on v5e/v6e/v7x; tiles are small
        ),
    )(t_row, x_t)

    return jnp.sum(partials)


def _reference_focal_loss_sum(logits, targets, gamma=2.0, alpha=0.25):
    """Pure-JAX reference matching the CUDA kernel semantics (un-simplified form)."""
    x = logits.astype(jnp.float32)
    N, C = x.shape
    t = targets.reshape(N, 1).astype(jnp.int32)
    d = jnp.arange(C, dtype=jnp.int32)[None, :]
    c1 = (t == d + 1).astype(jnp.float32)
    c2 = jnp.logical_and(t >= 0, t != d + 1).astype(jnp.float32)
    p = jax.nn.sigmoid(x)
    flt_min = jnp.float32(np.finfo(np.float32).tiny)
    term1 = jnp.power(1.0 - p, gamma) * jnp.log(jnp.maximum(p, flt_min))
    xpos = (x >= 0).astype(jnp.float32)
    term2 = jnp.power(p, gamma) * (-x * xpos - jnp.log1p(jnp.exp(x - 2.0 * x * xpos)))
    loss = -c1 * term1 * alpha - c2 * term2 * (1.0 - alpha)
    return jnp.sum(loss)


if __name__ == "__main__":
    # SigmoidFocalLoss has no learnable parameters; only gamma/alpha hyperparams.
    gamma, alpha = 2.0, 0.25

    N, C = 64, 8  # small shapes: 64 anchors, 8 foreground classes
    key = jax.random.PRNGKey(0)
    k_logits, k_targets = jax.random.split(key)
    logits = jax.random.normal(k_logits, (N, C), dtype=jnp.float32) * 2.0
    # labels in [0, C]: 0 = background, 1..C = foreground classes
    targets = jax.random.randint(k_targets, (N,), 0, C + 1, dtype=jnp.int32)

    loss = sigmoid_focal_loss_sum(logits, targets, gamma=gamma, alpha=alpha)
    loss = jax.block_until_ready(loss)

    ref = jax.block_until_ready(
        _reference_focal_loss_sum(logits, targets, gamma=gamma, alpha=alpha)
    )
    assert np.allclose(np.asarray(loss), np.asarray(ref), rtol=1e-4, atol=1e-4), (
        f"mismatch: pallas={loss} ref={ref}"
    )

    print("KERNEL_OK")
</pallas_src>

<mosaic_0001>
module attributes {stable_mosaic.version = 11 : i64} {
  func.func @_focal_loss_kernel(%arg0: i32, %arg1: memref<1x128xi32, #tpu.memory_space<vmem>>, %arg2: memref<8x128xf32, #tpu.memory_space<vmem>>, %arg3: memref<1x128xf32, #tpu.memory_space<vmem>>) attributes {dimension_semantics = [#tpu.dimension_semantics<parallel>], iteration_bounds = array<i64: 1>, scalar_prefetch = 0 : i64, scratch_operands = 0 : i64, tpu.core_type = #tpu.core_type<tc>, window_params = [{transform_indices = @transform_0, window_bounds = array<i64: 1, 128>}, {transform_indices = @transform_1, window_bounds = array<i64: 8, 128>}, {transform_indices = @transform_2, window_bounds = array<i64: 1, 128>}]} {
    %c0 = arith.constant 0 : index
    %c0_0 = arith.constant 0 : index
    %0 = vector.load %arg2[%c0, %c0_0] : memref<8x128xf32, #tpu.memory_space<vmem>>, vector<8x128xf32>
    %c0_1 = arith.constant 0 : index
    %c0_2 = arith.constant 0 : index
    %1 = vector.load %arg1[%c0_1, %c0_2] : memref<1x128xi32, #tpu.memory_space<vmem>>, vector<1x128xi32>
    %2 = tpu.iota {dimensions = array<i32: 0>} : vector<8x128xi32>
    %c1_i32 = arith.constant 1 : i32
    %3 = vector.broadcast %c1_i32 : i32 to vector<8x128xi32>
    %4 = arith.addi %2, %3 : vector<8x128xi32>
    %5 = vector.broadcast %1 : vector<1x128xi32> to vector<8x128xi32>
    %6 = arith.cmpi eq, %5, %4 : vector<8x128xi32>
    %7 = arith.extui %6 : vector<8x128xi1> to vector<8x128xi32>
    %8 = arith.sitofp %7 : vector<8x128xi32> to vector<8x128xf32>
    %c0_i32 = arith.constant 0 : i32
    %9 = vector.broadcast %c0_i32 : i32 to vector<1x128xi32>
    %10 = arith.cmpi sge, %1, %9 : vector<1x128xi32>
    %c1_i32_3 = arith.constant 1 : i32
    %11 = vector.broadcast %c1_i32_3 : i32 to vector<8x128xi32>
    %12 = arith.addi %2, %11 : vector<8x128xi32>
    %13 = vector.broadcast %1 : vector<1x128xi32> to vector<8x128xi32>
    %14 = arith.cmpi ne, %13, %12 : vector<8x128xi32>
    %15 = vector.broadcast %10 : vector<1x128xi1> to vector<8x128xi1>
    %16 = arith.andi %15, %14 : vector<8x128xi1>
    %17 = arith.extui %16 : vector<8x128xi1> to vector<8x128xi32>
    %18 = arith.sitofp %17 : vector<8x128xi32> to vector<8x128xf32>
    %19 = math.absf %0 : vector<8x128xf32>
    %cst = arith.constant 0.000000e+00 : f32
    %20 = vector.broadcast %cst : f32 to vector<8x128xf32>
    %21 = arith.subf %20, %19 : vector<8x128xf32>
    %22 = math.exp %21 : vector<8x128xf32>
    %23 = math.log1p %22 : vector<8x128xf32>
    %cst_4 = arith.constant 0.000000e+00 : f32
    %24 = vector.broadcast %cst_4 : f32 to vector<8x128xf32>
    %25 = arith.maximumf %0, %24 : vector<8x128xf32>
    %26 = arith.addf %23, %25 : vector<8x128xf32>
    %cst_5 = arith.constant 0.000000e+00 : f32
    %27 = vector.broadcast %cst_5 : f32 to vector<8x128xf32>
    %28 = arith.subf %27, %0 : vector<8x128xf32>
    %cst_6 = arith.constant 0.000000e+00 : f32
    %29 = vector.broadcast %cst_6 : f32 to vector<8x128xf32>
    %30 = arith.maximumf %28, %29 : vector<8x128xf32>
    %31 = arith.addf %23, %30 : vector<8x128xf32>
    %cst_7 = arith.constant 0.000000e+00 : f32
    %32 = vector.broadcast %cst_7 : f32 to vector<8x128xf32>
    %33 = arith.cmpf oge, %0, %32 : vector<8x128xf32>
    %cst_8 = arith.constant 1.000000e+00 : f32
    %34 = vector.broadcast %cst_8 : f32 to vector<8x128xf32>
    %35 = arith.select %33, %34, %22 : vector<8x128xi1>, vector<8x128xf32>
    %cst_9 = arith.constant 1.000000e+00 : f32
    %36 = vector.broadcast %cst_9 : f32 to vector<8x128xf32>
    %37 = arith.addf %36, %22 : vector<8x128xf32>
    %38 = arith.divf %35, %37 : vector<8x128xf32>
    %cst_10 = arith.constant 1.000000e+00 : f32
    %39 = vector.broadcast %cst_10 : f32 to vector<8x128xf32>
    %40 = arith.subf %39, %38 : vector<8x128xf32>
    %41 = arith.mulf %40, %40 : vector<8x128xf32>
    %42 = arith.mulf %38, %38 : vector<8x128xf32>
    %cst_11 = arith.constant 0.000000e+00 : f32
    %43 = vector.broadcast %cst_11 : f32 to vector<8x128xf32>
    %44 = arith.subf %43, %31 : vector<8x128xf32>
    %cst_12 = arith.constant -87.3365478 : f32
    %45 = vector.broadcast %cst_12 : f32 to vector<8x128xf32>
    %46 = arith.maximumf %44, %45 : vector<8x128xf32>
    %47 = arith.mulf %41, %46 : vector<8x128xf32>
    %cst_13 = arith.constant 0.000000e+00 : f32
    %48 = vector.broadcast %cst_13 : f32 to vector<8x128xf32>
    %49 = arith.subf %48, %26 : vector<8x128xf32>
    %50 = arith.mulf %42, %49 : vector<8x128xf32>
    %cst_14 = arith.constant 0.000000e+00 : f32
    %51 = vector.broadcast %cst_14 : f32 to vector<8x128xf32>
    %52 = arith.subf %51, %8 : vector<8x128xf32>
    %53 = arith.mulf %52, %47 : vector<8x128xf32>
    %cst_15 = arith.constant 2.500000e-01 : f32
    %54 = vector.broadcast %cst_15 : f32 to vector<8x128xf32>
    %55 = arith.mulf %53, %54 : vector<8x128xf32>
    %56 = arith.mulf %18, %50 : vector<8x128xf32>
    %cst_16 = arith.constant 7.500000e-01 : f32
    %57 = vector.broadcast %cst_16 : f32 to vector<8x128xf32>
    %58 = arith.mulf %56, %57 : vector<8x128xf32>
    %59 = arith.subf %55, %58 : vector<8x128xf32>
    %cst_17 = arith.constant dense<0.000000e+00> : vector<128xf32>
    %60 = vector.multi_reduction <add>, %59, %cst_17 [0] : vector<8x128xf32> to vector<128xf32>
    %61 = vector.shape_cast %60 : vector<128xf32> to vector<1x128xf32>
    %c0_18 = arith.constant 0 : index
    %c0_19 = arith.constant 0 : index
    %62 = vector.load %arg3[%c0_18, %c0_19] : memref<1x128xf32, #tpu.memory_space<vmem>>, vector<1x128xf32>
    tpu.vector_store %arg3[%c0_18, %c0_19], %61 {strides = array<i32>} : memref<1x128xf32, #tpu.memory_space<vmem>>, vector<1x128xf32>,
    return
  }
  func.func @transform_0(%arg0: i32) -> (i32, i32) {
    %c0_i32 = arith.constant 0 : i32
    %c0_i32_0 = arith.constant 0 : i32
    return %c0_i32, %arg0 : i32, i32
  }
  func.func @transform_1(%arg0: i32) -> (i32, i32) {
    %c0_i32 = arith.constant 0 : i32
    %c0_i32_0 = arith.constant 0 : i32
    return %c0_i32, %arg0 : i32, i32
  }
  func.func @transform_2(%arg0: i32) -> (i32, i32) {
    %c0_i32 = arith.constant 0 : i32
    %c0_i32_0 = arith.constant 0 : i32
    return %c0_i32, %arg0 : i32, i32
  }
}

</mosaic_0001>

<bundles_post_ra>
// kernel: tpu_custom_call.1
= control target key start
LH: loop header
LB: loop body
LE: loop exit
PB: predicated region body
PF: predicated region fallthrough
CT: control target
= control target key end

     0   :  { %7 = vsyncpa [#allocation3], 0  ;;  %s260_s0 = inlined_call_operand.hbm [shape: s32[1,128], index: 0, kind: input, shape index: {}]   ;;  %s261_s1 = inlined_call_operand.hbm [shape: f32[8,128], index: 1, kind: input, shape index: {}]   ;;  %s262_s2 = inlined_call_operand.hbm [shape: f32[1,128], index: 2, kind: output, shape index: {}]  }
   0x1   :  { %8 = vsyncpa [#allocation6], 0 }
   0x2   :  { %9 = vsyncpa [#allocation4], 0  ;;  %s204_s9 = smov [#allocation2]   ;;  %s205_s11 = smov [#allocation5]  }
   0x3   :  { %s16_s10 = sshll.u32 %s204_s9, 4  ;;  %s26_s12 = sshll.u32 %s205_s11, 4  ;;  %s17_s10 = int_to_ptr.vmem [resolvable:$true] %s16_s10  ;;  %s27_s12 = int_to_ptr.vmem [resolvable:$true] %s26_s12 }
   0x4   :  { %s132_s15 = scalar_lea.hbm %s260_s0, 16 }
   0x5   :  { %p133_p0 = scmp.ne.s32.totalorder %s260_s0, %s132_s15  ;;  %p136_p1 = scmp.lt.u32.totalorder %s132_s15, %s260_s0 }
   0x7   :  { %p138_p2 = pnand %p136_p1, %p133_p0 }
   0x9   :  { %141 = shalt.err (!%p138_p2)
}
   0xa   :  { %s142_s20 = scalar_lea.vmem %s17_s10, 16  ;;  %s146_s21 = scalar_lea.vmem %s17_s10, 32 }
   0xb   :  { %p143_p3 = scmp.ne.s32.totalorder %s17_s10, %s142_s20  ;;  %p147_p4 = scmp.lt.s32.totalorder %s17_s10, %s17_s10 }
   0xc   :  { %p148_p5 = scmp.lt.s32.totalorder %s146_s21, %s142_s20 }
   0xe   :  { %p149_p6 = por %p148_p5, %p147_p4 }
  0x10   :  { %p150_p7 = pnand %p149_p6, %p143_p3 }
  0x12   :  { %153 = shalt.err (!%p150_p7)
}
  0x13   :  { %19 = dma.hbm_to_vmem [thread:$0]  %s260_s0, 16, %s17_s10, [#allocation3]  }
  0x14   :  { %s154_s26 = scalar_lea.hbm %s261_s1, 128 }
  0x15   :  { %p155_p8 = scmp.ne.s32.totalorder %s261_s1, %s154_s26  ;;  %p158_p9 = scmp.lt.u32.totalorder %s154_s26, %s261_s1 }
  0x17   :  { %p160_p10 = pnand %p158_p9, %p155_p8 }
  0x19   :  { %163 = shalt.err (!%p160_p10)
}
  0x1a   :  { %s164_s3 = scalar_lea.vmem %s27_s12, 128  ;;  %p169_p12 = scmp.lt.s32.totalorder %s27_s12, %s27_s12 }
  0x1b   :  { %p165_p11 = scmp.ne.s32.totalorder %s27_s12, %s164_s3  ;;  %p170_p13 = scmp.lt.s32.totalorder %s164_s3, %s164_s3 }
  0x1d   :  { %p171_p0 = por %p170_p13, %p169_p12 }
  0x1f   :  { %p172_p1 = pnand %p171_p0, %p165_p11 }
  0x21   :  { %175 = shalt.err (!%p172_p1)
}
  0x22   :  { %29 = dma.hbm_to_vmem [thread:$0]  %s261_s1, 128, %s27_s12, [#allocation6]  }
  0x23   :  { %198 = dma.done.wait [#allocation3], 16  }
  0x24   :  { %199 = vsyncadd [#allocation3], 4294967280 }
  0x25   :  { %200 = dma.done.wait [#allocation6], 128  }
  0x26   :  { %201 = vsyncadd [#allocation6], 4294967168  ;;  %v36_v0 = vld [vmem:[#allocation5] sm:$0xff]  ;;  %v38_v4 = vlaneseq  ;;  %v37_v6 = vld [vmem:[#allocation2] sm:$0x1]  ;;  %v206_v11 = vmov 0  }
  0x27   :  { %v59_v1 = vand.u32 2147483647, %v36_v0  ;;  %vm48_vm0 = vcmp.ge.s32.totalorder %v37_v6, 0  ;;  %v74_v15 = vsub.f32 0.0, %v36_v0  ;;  %vm77_vm1 = vcmp.ge.f32.partialorder %v36_v0, 0.0  ;;  %s208_s1 = smov [#allocation7]  }
  0x28   :  { %v39_v8 = vshrl.u32 %v38_v4, 7  ;;  %v50_v12 = vsel %vm48_vm0, 1, %v206_v11  ;;  %v72_v22 = vmax.f32 %v36_v0, 0.0  ;;  %v207_v32 = vmov 0.0   ;;  %s109_s5 = sshll.u32 %s208_s1, 4  ;;  %s110_s5 = int_to_ptr.vmem [resolvable:$true] %s109_s5 }
  0x29   :  { %v60_v2 = vsub.f32 0.0, %v59_v1  ;;  %v75_v23 = vmax.f32 %v74_v15, 0.0  ;;  %s176_s6 = scalar_lea.vmem %s110_s5, 16  ;;  %s180_s7 = scalar_lea.vmem %s110_s5, 32 }
  0x2a   :  { %v43_v10 = vsub.s32 0, %v39_v8  ;;  %v40_v16 = vadd.s32 1, %v39_v8  ;;  %p177_p2 = scmp.ne.s32.totalorder %s110_s5, %s176_s6  ;;  %p181_p3 = scmp.lt.s32.totalorder %s110_s5, %s110_s5 }
  0x2b   :  { %v61_v3 = vmul.f32 1.442695, %v60_v2  ;;  %p182_p4 = scmp.lt.s32.totalorder %s180_s7, %s176_s6 }
  0x2c   :  { %v44_v17 = vrot.slane %v37_v6, %v43_v10  ;;  %v54_v18 = vrot.slane %v50_v12, %v43_v10 }
  0x2d   :  { %126 = vpow2.f32 %v61_v3  ;;  %p183_p5 = por %p182_p4, %p181_p3 }
  0x2e   :  { %vm49_vm3 = vcmp.ne.s32.totalorder %v44_v17, %v40_v16  ;;  %vm55_vm4 = vcmp.eq.s32.totalorder %v54_v18, 1  ;;  %vm45_vm5 = vcmp.eq.s32.totalorder %v44_v17, %v40_v16 }
  0x2f   :  { %vm56_vm6 = vmand %vm55_vm4, %vm49_vm3  ;;  %v119_v33 = vsel %vm45_vm5, 1.0, %v207_v32  ;;  %p184_p6 = pnand %p183_p5, %p177_p2 }
  0x30   :  { %v120_v37 = vsel %vm56_vm6, 1.0, %v207_v32  ;;  %v90_v40 = vsub.f32 0.0, %v119_v33 }
  0x37   :  { %v127_v5 = vpop.eup %126 }
  0x38   :  { %v63_v7 = vadd.f32 1.0, %v127_v5  ;;  %v66_v9 = vmul.f32 -0.5, %v127_v5  ;;  %v69_v14 = vand.u32 2147483647, %v127_v5  ;;  %v78_v20 = vsel %vm77_vm1, 1.0, %v127_v5 }
  0x3a   :  { %128 = vlog2.f32 %v63_v7  ;;  %v67_v13 = vadd.f32 1.0, %v66_v9  ;;  %vm70_vm2 = vcmp.lt.f32.partialorder %v69_v14, 0.0004427343 }
  0x3b   :  { %130 = vrcp.f32 %v63_v7 }
  0x3c   :  { %v68_v19 = vmul.f32 %v127_v5, %v67_v13 }
  0x44   :  { %v129_v21 = vpop.eup %128 }
  0x45   :  { %v131_v24 = vpop.eup %130  ;;  %v65_v25 = vmul.f32 0.6931472, %v129_v21 }
  0x46   :  { %v81_v26 = vmul.f32 %v131_v24, %v78_v20 }
  0x47   :  { %v71_v27 = vsel %vm70_vm2, %v68_v19, %v65_v25 }
  0x48   :  { %v73_v28 = vadd.f32 %v72_v22, %v71_v27  ;;  %v76_v29 = vadd.f32 %v75_v23, %v71_v27  ;;  %v82_v30 = vsub.f32 1.0, %v81_v26  ;;  %v84_v31 = vmul.f32 %v81_v26, %v81_v26 }
  0x4a   :  { %v83_v34 = vmul.f32 %v82_v30, %v82_v30  ;;  %v85_v35 = vsub.f32 0.0, %v76_v29  ;;  %v88_v36 = vsub.f32 0.0, %v73_v28 }
  0x4c   :  { %v86_v38 = vmax.f32 %v85_v35, -87.33655  ;;  %v89_v39 = vmul.f32 %v88_v36, %v84_v31 }
  0x4e   :  { %v87_v41 = vmul.f32 %v86_v38, %v83_v34  ;;  %v93_v42 = vmul.f32 %v120_v37, %v89_v39 }
  0x50   :  { %v91_v43 = vmul.f32 %v90_v40, %v87_v41  ;;  %v94_v44 = vmul.f32 0.75, %v93_v42 }
  0x52   :  { %v92_v45 = vmul.f32 0.25, %v91_v43 }
  0x54   :  { %v95_v46 = vsub.f32 %v92_v45, %v94_v44 }
  0x56   :  { %v96_v47 = vrot.slane %v95_v46, 4 }
  0x58   :  { %v97_v48 = vadd.f32 %v96_v47, %v95_v46 }
  0x5a   :  { %v98_v49 = vrot.slane %v97_v48, 2 }
  0x5c   :  { %v99_v50 = vadd.f32 %v98_v49, %v97_v48 }
  0x5e   :  { %v100_v51 = vrot.slane %v99_v50, 1 }
  0x60   :  { %v101_v52 = vadd.f32 %v100_v51, %v99_v50 }
  0x62   :  { %102 = vst [vmem:[#allocation7] sm:$0x1] %v101_v52 }
  0x63   :  { %187 = shalt.err (!%p184_p6)
}
  0x64   :  { %s188_s10 = scalar_lea.hbm %s262_s2, 16 }
  0x65   :  { %p189_p7 = scmp.ne.s32.totalorder %s262_s2, %s188_s10  ;;  %p192_p8 = scmp.lt.u32.totalorder %s188_s10, %s262_s2 }
  0x67   :  { %p194_p9 = pnand %p192_p8, %p189_p7 }
  0x69   :  { %197 = shalt.err (!%p194_p9)
}
  0x6a   :  { %112 = dma.vmem_to_hbm [thread:$0]  %s110_s5, 16, %s262_s2, [#allocation4]  }
  0x6b   :  { %202 = dma.done.wait [#allocation4], 16  }
  0x6c   :  { %203 = vsyncadd [#allocation4], 4294967280 }
  0x6d   :  { %116 = vsyncpa [#allocation3], 1 }
  0x6e   :  { %117 = vsyncpa [#allocation6], 1 }
  0x6f   :  { %118 = vsyncpa [#allocation4], 1 }

</bundles_post_ra>
